<compile_context>
chip_gen: v7x
topology: tpu7x:2x2x1
jax: 0.10.0
libtpu: 0.0.40
codegen_flags: <defaults>
</compile_context>

<pallas_src>
import functools

import jax
import jax.numpy as jnp
import numpy as np
from jax.experimental import pallas as pl
from jax.experimental.pallas import tpu as pltpu


_LANE = 128
_SUBLANE = 8
# Pixels per grid step.  Dense layout: depth 4 B/px + out 16 B/px, double
# buffered ~40 B/px => 64K px ~ 2.6 MB of block storage plus ~1 MB of
# temporaries — safe inside scoped-VMEM defaults on v5e/v6e/v7x.
# (Can be raised toward 128K–256K px on v6e/v7x.)
_MAX_TILE_PX = 64 * 1024


def get_xy_homo_coords(height: int, width: int) -> jnp.ndarray:
    """Homogeneous pixel coordinates, shape [3, H*W], float32 (matches torch ref)."""
    y, x = np.meshgrid(np.arange(height), np.arange(width), indexing="ij")
    x = x.reshape(1, height * width)
    y = y.reshape(1, height * width)
    xy = np.concatenate([x, y, np.ones_like(x)], axis=0).astype(np.float32)
    return jnp.asarray(xy)


def _backproject_kernel(invk_ref, depth_ref, out_ref, *,
                        width, rpb, tc, cols_is_width):
    # invk_ref : (B, 9)           f32, whole array resident in SMEM
    # depth_ref: (1, rpb, tc)     depth tile, dense (8,128)-aligned layout
    # out_ref  : (1, 4, rpb, tc)  f32 output tile
    b = pl.program_id(0)
    r = pl.program_id(1)

    d = depth_ref[0].astype(jnp.float32)                       # (rpb, tc)

    # Pixel coordinates generated in-kernel (no constant streamed from HBM).
    # Flattened pixel index of element (row, col) in this tile:
    #   n = (r*rpb + row) * tc + col.
    row_i = jax.lax.broadcasted_iota(jnp.int32, (rpb, tc), 0) + r * rpb
    col_i = jax.lax.broadcasted_iota(jnp.int32, (rpb, tc), 1)
    if cols_is_width:
        # Tile columns are exactly one image row: x = col, y = global row.
        x = col_i.astype(jnp.float32)
        y = row_i.astype(jnp.float32)
    else:
        # x = n % W, y = n // W via reciprocal multiply + exactness fixup.
        # TODO(synk): exact only for H*W < 2**24; use an integer recurrence or
        # scalar-prefetched per-tile row bases for larger images.
        idx = (row_i * tc + col_i).astype(jnp.float32)
        w_f = jnp.float32(width)
        y = jnp.floor(idx * jnp.float32(1.0 / width))
        x = idx - y * w_f
        lo = x < 0.0
        y = jnp.where(lo, y - 1.0, y)
        x = jnp.where(lo, x + w_f, x)
        hi = x >= w_f
        y = jnp.where(hi, y + 1.0, y)
        x = jnp.where(hi, x - w_f, x)

    # Degenerate 3x3 matmul as scalar-broadcast FMA chains on the VPU.
    k = [invk_ref[b, j] for j in range(9)]
    row0 = (k[0] * x + k[1] * y + k[2]) * d
    row1 = (k[3] * x + k[4] * y + k[5]) * d
    row2 = (k[6] * x + k[7] * y + k[8]) * d
    row3 = jnp.ones_like(d)

    # One whole-block dense store (no single-sublane masked writes).
    out_ref[0] = jnp.stack([row0, row1, row2, row3], axis=0)


def backproject_depth(depth: jnp.ndarray, inv_K: jnp.ndarray,
                      *, max_tile_px: int = _MAX_TILE_PX) -> jnp.ndarray:
    """
    depth:  [B, 1, H, W] (any float dtype; cast to f32 inside the kernel)
    inv_K:  [B, 3, 3]    (only [:3,:3] used, as in the torch ref)
    returns [B, 4, H*W]  float32
    """
    bs, _, h, w = depth.shape
    hw = h * w

    # ---- lane-dense 2-D pixel layout (rows, tc), tc a multiple of 128.
    cols_is_width = (w % _LANE == 0)
    if cols_is_width:
        tc = w
    elif hw % 512 == 0:
        tc = 512
    elif hw % 256 == 0:
        tc = 256
    else:
        tc = _LANE
    hw_pad = -(-hw // tc) * tc                    # pad only to a lane multiple
    rows = hw_pad // tc

    # ---- rows per block: multiple of 8 (or the full dim for tiny inputs).
    if rows < _SUBLANE:
        rpb = rows
    else:
        target = max(_SUBLANE, (max_tile_px // tc) // _SUBLANE * _SUBLANE)
        rpb = max(_SUBLANE, min(target, (rows // _SUBLANE) * _SUBLANE))
    grid_rows = -(-rows // rpb)
    # v7x has 2 TensorCores: make sure the parallel grid has >= 2 steps.
    if bs * grid_rows < 2 and rpb > _SUBLANE:
        rpb = max(_SUBLANE, ((rpb // 2) + _SUBLANE - 1) // _SUBLANE * _SUBLANE)
        grid_rows = -(-rows // rpb)

    # ---- reshape inputs (metadata-only unless a small lane pad is needed).
    depth_2d = depth.reshape(bs, hw)              # keep caller dtype (no upcast)
    if hw_pad != hw:
        depth_2d = jnp.pad(depth_2d, ((0, 0), (0, hw_pad - hw)))
    depth_tiled = depth_2d.reshape(bs, rows, tc)
    invk_flat = inv_K[:, :3, :3].reshape(bs, 9).astype(jnp.float32)

    kernel = functools.partial(_backproject_kernel, width=w, rpb=rpb, tc=tc,
                               cols_is_width=cols_is_width)

    bytes_accessed = (depth_tiled.size * depth_tiled.dtype.itemsize
                      + invk_flat.size * 4
                      + bs * 4 * hw_pad * 4)

    out = pl.pallas_call(
        kernel,
        out_shape=jax.ShapeDtypeStruct((bs, 4, rows, tc), jnp.float32),
        grid_spec=pltpu.PrefetchScalarGridSpec(
            num_scalar_prefetch=0,
            grid=(bs, grid_rows),
            in_specs=[
                # inv_K coefficients: whole (B, 9) array in SMEM, read as scalars.
                pl.BlockSpec(memory_space=pltpu.MemorySpace.SMEM),
                # depth: one dense (rpb, tc) tile per grid step.
                pl.BlockSpec((1, rpb, tc), lambda b, r: (b, r, 0)),
            ],
            out_specs=pl.BlockSpec((1, 4, rpb, tc), lambda b, r: (b, 0, r, 0)),
        ),
        compiler_params=pltpu.CompilerParams(
            dimension_semantics=("parallel", "parallel")),
        cost_estimate=pl.CostEstimate(flops=9 * bs * hw, transcendentals=0,
                                      bytes_accessed=bytes_accessed),
    )(invk_flat, depth_tiled)

    out = out.reshape(bs, 4, hw_pad)              # free metadata reshape
    if hw_pad != hw:
        out = out[:, :, :hw]
    return out


def backproject_depth_ref(depth, inv_K, pix_coords):
    """Pure-JAX reference matching the PyTorch forward."""
    bs, _, h, w = depth.shape
    cam = jnp.einsum("bij,jn->bin",
                     inv_K[:, :3, :3].astype(jnp.float32), pix_coords)
    cam = depth.reshape(bs, 1, h * w).astype(jnp.float32) * cam
    ones = jnp.ones((bs, 1, h * w), jnp.float32)
    return jnp.concatenate([cam, ones], axis=1)


def _run_case(key, B, H, W):
    k_d, k_k = jax.random.split(key)
    depth = jax.random.uniform(k_d, (B, 1, H, W), jnp.float32, 0.1, 10.0)

    fx, fy, cx, cy = float(W), float(H), W / 2.0, H / 2.0
    K = np.array([[fx, 0.0, cx], [0.0, fy, cy], [0.0, 0.0, 1.0]], np.float32)
    inv_K_base = np.linalg.inv(K)
    jitter = jax.random.normal(k_k, (B, 3, 3), jnp.float32) * 1e-3
    inv_K = jnp.asarray(inv_K_base)[None] + jitter

    out = backproject_depth(depth, inv_K)
    jax.block_until_ready(out)

    pix_coords = get_xy_homo_coords(H, W)
    ref = backproject_depth_ref(depth, inv_K, pix_coords)

    assert out.shape == (B, 4, H * W), out.shape
    np.testing.assert_allclose(np.asarray(out), np.asarray(ref),
                               rtol=1e-5, atol=1e-5)


if __name__ == "__main__":
    key = jax.random.PRNGKey(0)
    k1, k2 = jax.random.split(key)
    # Small case (general modulo path, tc=256, rows=1).
    _run_case(k1, B=2, H=16, W=16)
    # Lane-aligned width case (cols_is_width path, dense (16,128) tiles).
    _run_case(k2, B=2, H=16, W=128)
    print("KERNEL_OK")
</pallas_src>

<mosaic_0001>
module attributes {stable_mosaic.version = 11 : i64} {
  func.func @_backproject_kernel(%arg0: i32, %arg1: i32, %arg2: memref<2x9xf32, #tpu.memory_space<smem>>, %arg3: memref<1x1x256xf32, #tpu.memory_space<vmem>>, %arg4: memref<1x4x1x256xf32, #tpu.memory_space<vmem>>) attributes {dimension_semantics = [#tpu.dimension_semantics<parallel>, #tpu.dimension_semantics<parallel>], iteration_bounds = array<i64: 2, 1>, scalar_prefetch = 0 : i64, scratch_operands = 0 : i64, tpu.core_type = #tpu.core_type<tc>, window_params = [{transform_indices = @transform_0, window_bounds = array<i64: 2, 9>}, {transform_indices = @transform_1, window_bounds = array<i64: 1, 1, 256>}, {transform_indices = @transform_2, window_bounds = array<i64: 1, 4, 1, 256>}]} {
    %c0 = arith.constant 0 : index
    %c0_0 = arith.constant 0 : index
    %c0_1 = arith.constant 0 : index
    %0 = vector.load %arg3[%c0, %c0_0, %c0_1] : memref<1x1x256xf32, #tpu.memory_space<vmem>>, vector<1x1x256xf32>
    %1 = vector.shape_cast %0 : vector<1x1x256xf32> to vector<1x256xf32>
    %2 = tpu.iota {dimensions = array<i32: 0>} : vector<1x256xi32>
    %c1_i32 = arith.constant 1 : i32
    %3 = arith.muli %arg1, %c1_i32 : i32
    %4 = vector.broadcast %3 : i32 to vector<1x256xi32>
    %5 = arith.addi %2, %4 : vector<1x256xi32>
    %6 = tpu.iota {dimensions = array<i32: 1>} : vector<1x256xi32>
    %c256_i32 = arith.constant 256 : i32
    %7 = vector.broadcast %c256_i32 : i32 to vector<1x256xi32>
    %8 = arith.muli %5, %7 : vector<1x256xi32>
    %9 = arith.addi %8, %6 : vector<1x256xi32>
    %10 = arith.sitofp %9 : vector<1x256xi32> to vector<1x256xf32>
    %cst = arith.constant 6.250000e-02 : f32
    %11 = vector.broadcast %cst : f32 to vector<1x256xf32>
    %12 = arith.mulf %10, %11 : vector<1x256xf32>
    %13 = math.floor %12 : vector<1x256xf32>
    %cst_2 = arith.constant 1.600000e+01 : f32
    %14 = vector.broadcast %cst_2 : f32 to vector<1x256xf32>
    %15 = arith.mulf %13, %14 : vector<1x256xf32>
    %16 = arith.subf %10, %15 : vector<1x256xf32>
    %cst_3 = arith.constant 0.000000e+00 : f32
    %17 = vector.broadcast %cst_3 : f32 to vector<1x256xf32>
    %18 = arith.cmpf olt, %16, %17 : vector<1x256xf32>
    %cst_4 = arith.constant 1.000000e+00 : f32
    %19 = vector.broadcast %cst_4 : f32 to vector<1x256xf32>
    %20 = arith.subf %13, %19 : vector<1x256xf32>
    %21 = arith.select %18, %20, %13 : vector<1x256xi1>, vector<1x256xf32>
    %cst_5 = arith.constant 1.600000e+01 : f32
    %22 = vector.broadcast %cst_5 : f32 to vector<1x256xf32>
    %23 = arith.addf %16, %22 : vector<1x256xf32>
    %24 = arith.select %18, %23, %16 : vector<1x256xi1>, vector<1x256xf32>
    %cst_6 = arith.constant 1.600000e+01 : f32
    %25 = vector.broadcast %cst_6 : f32 to vector<1x256xf32>
    %26 = arith.cmpf oge, %24, %25 : vector<1x256xf32>
    %cst_7 = arith.constant 1.000000e+00 : f32
    %27 = vector.broadcast %cst_7 : f32 to vector<1x256xf32>
    %28 = arith.addf %21, %27 : vector<1x256xf32>
    %29 = arith.select %26, %28, %21 : vector<1x256xi1>, vector<1x256xf32>
    %cst_8 = arith.constant 1.600000e+01 : f32
    %30 = vector.broadcast %cst_8 : f32 to vector<1x256xf32>
    %31 = arith.subf %24, %30 : vector<1x256xf32>
    %32 = arith.select %26, %31, %24 : vector<1x256xi1>, vector<1x256xf32>
    %33 = arith.index_cast %arg0 : i32 to index
    %c0_9 = arith.constant 0 : index
    %34 = memref.load %arg2[%33, %c0_9] : memref<2x9xf32, #tpu.memory_space<smem>>
    %35 = arith.index_cast %arg0 : i32 to index
    %c1 = arith.constant 1 : index
    %36 = memref.load %arg2[%35, %c1] : memref<2x9xf32, #tpu.memory_space<smem>>
    %37 = arith.index_cast %arg0 : i32 to index
    %c2 = arith.constant 2 : index
    %38 = memref.load %arg2[%37, %c2] : memref<2x9xf32, #tpu.memory_space<smem>>
    %39 = arith.index_cast %arg0 : i32 to index
    %c3 = arith.constant 3 : index
    %40 = memref.load %arg2[%39, %c3] : memref<2x9xf32, #tpu.memory_space<smem>>
    %41 = arith.index_cast %arg0 : i32 to index
    %c4 = arith.constant 4 : index
    %42 = memref.load %arg2[%41, %c4] : memref<2x9xf32, #tpu.memory_space<smem>>
    %43 = arith.index_cast %arg0 : i32 to index
    %c5 = arith.constant 5 : index
    %44 = memref.load %arg2[%43, %c5] : memref<2x9xf32, #tpu.memory_space<smem>>
    %45 = arith.index_cast %arg0 : i32 to index
    %c6 = arith.constant 6 : index
    %46 = memref.load %arg2[%45, %c6] : memref<2x9xf32, #tpu.memory_space<smem>>
    %47 = arith.index_cast %arg0 : i32 to index
    %c7 = arith.constant 7 : index
    %48 = memref.load %arg2[%47, %c7] : memref<2x9xf32, #tpu.memory_space<smem>>
    %49 = arith.index_cast %arg0 : i32 to index
    %c8 = arith.constant 8 : index
    %50 = memref.load %arg2[%49, %c8] : memref<2x9xf32, #tpu.memory_space<smem>>
    %51 = vector.broadcast %34 : f32 to vector<1x256xf32>
    %52 = arith.mulf %51, %32 : vector<1x256xf32>
    %53 = vector.broadcast %36 : f32 to vector<1x256xf32>
    %54 = arith.mulf %53, %29 : vector<1x256xf32>
    %55 = arith.addf %52, %54 : vector<1x256xf32>
    %56 = vector.broadcast %38 : f32 to vector<1x256xf32>
    %57 = arith.addf %55, %56 : vector<1x256xf32>
    %58 = arith.mulf %57, %1 : vector<1x256xf32>
    %59 = vector.broadcast %40 : f32 to vector<1x256xf32>
    %60 = arith.mulf %59, %32 : vector<1x256xf32>
    %61 = vector.broadcast %42 : f32 to vector<1x256xf32>
    %62 = arith.mulf %61, %29 : vector<1x256xf32>
    %63 = arith.addf %60, %62 : vector<1x256xf32>
    %64 = vector.broadcast %44 : f32 to vector<1x256xf32>
    %65 = arith.addf %63, %64 : vector<1x256xf32>
    %66 = arith.mulf %65, %1 : vector<1x256xf32>
    %67 = vector.broadcast %46 : f32 to vector<1x256xf32>
    %68 = arith.mulf %67, %32 : vector<1x256xf32>
    %69 = vector.broadcast %48 : f32 to vector<1x256xf32>
    %70 = arith.mulf %69, %29 : vector<1x256xf32>
    %71 = arith.addf %68, %70 : vector<1x256xf32>
    %72 = vector.broadcast %50 : f32 to vector<1x256xf32>
    %73 = arith.addf %71, %72 : vector<1x256xf32>
    %74 = arith.mulf %73, %1 : vector<1x256xf32>
    %cst_10 = arith.constant 1.000000e+00 : f32
    %75 = vector.broadcast %cst_10 : f32 to vector<1x256xf32>
    %76 = vector.shape_cast %58 : vector<1x256xf32> to vector<1x1x256xf32>
    %77 = vector.shape_cast %66 : vector<1x256xf32> to vector<1x1x256xf32>
    %78 = vector.shape_cast %74 : vector<1x256xf32> to vector<1x1x256xf32>
    %79 = vector.shape_cast %75 : vector<1x256xf32> to vector<1x1x256xf32>
    %80 = tpu.concatenate %76, %77, %78, %79 in 0 : vector<1x1x256xf32>, vector<1x1x256xf32>, vector<1x1x256xf32>, vector<1x1x256xf32> -> vector<4x1x256xf32>
    %c0_11 = arith.constant 0 : index
    %c0_12 = arith.constant 0 : index
    %c0_13 = arith.constant 0 : index
    %c0_14 = arith.constant 0 : index
    %81 = vector.load %arg4[%c0_11, %c0_12, %c0_13, %c0_14] : memref<1x4x1x256xf32, #tpu.memory_space<vmem>>, vector<1x4x1x256xf32>
    %82 = vector.shape_cast %81 : vector<1x4x1x256xf32> to vector<4x1x256xf32>
    %83 = vector.shape_cast %80 : vector<4x1x256xf32> to vector<1x4x1x256xf32>
    tpu.vector_store %arg4[%c0_11, %c0_12, %c0_13, %c0_14], %83 {strides = array<i32>} : memref<1x4x1x256xf32, #tpu.memory_space<vmem>>, vector<1x4x1x256xf32>,
    return
  }
  func.func @transform_0(%arg0: i32, %arg1: i32) -> (i32, i32) {
    %c0_i32 = arith.constant 0 : i32
    %c0_i32_0 = arith.constant 0 : i32
    %c0_i32_1 = arith.constant 0 : i32
    return %c0_i32, %c0_i32_0 : i32, i32
  }
  func.func @transform_1(%arg0: i32, %arg1: i32) -> (i32, i32, i32) {
    %c0_i32 = arith.constant 0 : i32
    %c0_i32_0 = arith.constant 0 : i32
    return %arg0, %arg1, %c0_i32 : i32, i32, i32
  }
  func.func @transform_2(%arg0: i32, %arg1: i32) -> (i32, i32, i32, i32) {
    %c0_i32 = arith.constant 0 : i32
    %c0_i32_0 = arith.constant 0 : i32
    %c0_i32_1 = arith.constant 0 : i32
    return %arg0, %c0_i32, %arg1, %c0_i32_0 : i32, i32, i32, i32
  }
}

</mosaic_0001>

<bundles_post_ra>
// kernel: tpu_custom_call.1
= control target key start
LH: loop header
LB: loop body
LE: loop exit
PB: predicated region body
PF: predicated region fallthrough
CT: control target
= control target key end

     0   :  { %7 = vsyncpa [#allocation5], 0  ;;  %s1049_s0 = inlined_call_operand.hbm [shape: f32[2,9], index: 0, kind: input, shape index: {}]   ;;  %s1050_s1 = inlined_call_operand.hbm [shape: f32[2,1,256], index: 1, kind: input, shape index: {}]   ;;  %s1051_s2 = inlined_call_operand.hbm [shape: f32[2,4,1,256], index: 2, kind: output, shape index: {}]  }
   0x1   :  { %8 = vsyncpa [#allocation3], 0 }
   0x2   :  { %10 = vsyncpa [#allocation3 + $0x1], 0 }
   0x3   :  { %11 = vsyncpa [#allocation4], 0 }
   0x4   :  { %13 = vsyncpa [#allocation4 + $0x1], 0  ;;  %s747_s9 = smov 0   ;;  %s749_s10 = smov 0  }
   0x5   :  { %s751_s11 = smov 0   ;;  %s753_s12 = smov 0  }
   0x6   :  { %s755_s13 = smov 0   ;;  %s757_s14 = smov 0  }
   0x7 LB: > { %s493_s15 = sadd.s32 4294967295, %s723_s14   ;;  %s494_s16 = sadd.s32 4294967294, %s723_s14   ;;  %s723_s14 = sphi %s757_s14, %s19_s14   ;;  %s719_s13 = sphi %s755_s13, %s1077_s13   ;;  %s715_s12 = sphi %s753_s12, %s1076_s12   ;;  %s711_s11 = sphi %s751_s11, %s1075_s11   ;;  %s707_s10 = sphi %s749_s10, %s1074_s10   ;;  %s703_s9 = sphi %s747_s9, %s1073_s9  }
   0x8   : > { %p74_p0 = scmp.ne.s32.totalorder %s707_s10, %s703_s9  ;;  %p781_p1 = scmp.eq.s32.totalorder %s493_s15, 0 }
   0x9   : > { %p785_p2 = scmp.eq.s32.totalorder %s493_s15, 1  ;;  %p106_p3 = scmp.eq.s32.totalorder %s494_s16, 1 }
   0xa   : > { %s1056_s17 = scalar_select %p781_p1, 1, 0 }
   0xb   : > { %p791_p4 = por %p781_p1, %p74_p0  ;;  %p495_p5 = scmp.ge.s32.totalorder %s723_s14, 1 }
   0xc   : > { %p796_p6 = por %p106_p3, %p74_p0  ;;  %p113_p7 = scmp.lt.s32.totalorder %s723_s14, 3 }
   0xd   : > { %s1058_s19 = scalar_select %p791_p4, 1, 0 }
   0xe   : > { %s1059_s20 = scalar_select %p796_p6, 1, 0 }
   0xf   : > { %p801_p8 = pnand %p495_p5, %p113_p7  ;;  %s31_s22 = sadd.s32 1, %s719_s13 }
  0x10   : > { %p815_p12 = scmp.ge.s32.totalorder %s31_s22, 2  ;;  %s61_s25 = sadd.s32 1, %s711_s11 }
  0x11   : > { %p525_p10 = pneg %p801_p8  ;;  %p68_p13 = scmp.ne.s32.totalorder %s711_s11, %s707_s10 }
  0x12   : > { %p69_p0 = scmp.eq.s32.totalorder %s723_s14, 0  ;;  %s594_s28 = scalar_lea.hbm %s1049_s0, 32 }
  0x13   : > { %p811_p11 = pnand %p525_p10, %p781_p1  ;;  %p595_p3 = scmp.ne.s32.totalorder %s1049_s0, %s594_s28 }
  0x14   : > { %p601_p9 = scmp.lt.u32.totalorder %s594_s28, %s1049_s0 }
  0x15   : > { %p596_p5 = pneg %p811_p11 }
  0x17   : > { %p597_p7 = pnand %p596_p5, %p595_p3 }
  0x19   : > { %p598_p10 = pneg %p597_p7 }
  0x1b   : > { %p603_p6 = pnand %p601_p9, %p598_p10 }
  0x1d   : > { %606 = shalt.err (!%p603_p6)
}
  0x1e   : > { %s725_s5 = smov [#allocation2]   ;;  %s1079_s22 = smov (%p815_p12, %s31_s22), 0 }
  0x1f   : > { %528 = dma.hbm_to_smem (!%p811_p11), %s1049_s0, 32, %s725_s5, [#allocation5]  }
  0x20   : > { %p846_p6 = por %p69_p0, %p68_p13  ;;  %p855_p9 = por %p785_p2, %p68_p13 }
  0x21   : > { %s56_s16 = ssub.s32 %s719_s13, %s1079_s22  ;;  %p538_p3 = scmp.lt.s32.totalorder %s723_s14, 2 }
  0x22   : > { %s1064_s15 = scalar_select %p855_p9, 1, 0 }
  0x23   : > { %p59_p5 = scmp.eq.s32.totalorder %s56_s16, 0  ;;  %s135_s23 = sand.u32 1, %s711_s11  }
  0x24   : > { %s498_s24 = sshll.u32 %s135_s23, 1  ;;  %s515_s27 = sshll.u32 %s719_s13, 5 }
  0x25   : > { %s864_s26 = scalar_select %p59_p5, %s711_s11, %s61_s25  }
  0x26   : > { %s870_s30 = scalar_lea.hbm %s1050_s1, %s515_s27  ;;  %s139_s18 = scalar_lea.vmem [#allocation6], %s498_s24 }
  0x27   : > { %s149_s3 = sshll.u32 %s139_s18, 4  ;;  %p876_p2 = pnand %p538_p3, %p846_p6  ;;  %s872_s3 = int_to_ptr.vmem [resolvable:$true] %s149_s3 }
  0x28   : > { %s136_s25 = scalar_lea.sflag [#allocation3], %s135_s23  ;;  %s607_s5 = scalar_lea.hbm %s870_s30, 32 }
  0x29   : > { %p608_p11 = scmp.ne.s32.totalorder %s870_s30, %s607_s5  ;;  %p609_p12 = pneg %p876_p2 }
  0x2a   : > { %s612_s16 = scalar_lea.hbm %s1050_s1, 64  ;;  %p613_p7 = scmp.lt.u32.totalorder %s870_s30, %s1050_s1 }
  0x2b   : > { %p610_p13 = pnand %p609_p12, %p608_p11  ;;  %p614_p10 = scmp.lt.u32.totalorder %s612_s16, %s607_s5 }
  0x2c   : > { %p616_p3 = scmp.lt.u32.totalorder %s607_s5, %s870_s30 }
  0x2d   : > { %p611_p0 = pneg %p610_p13  ;;  %p615_p6 = por %p614_p10, %p613_p7 }
  0x2f   : > { %p617_p5 = por %p616_p3, %p615_p6 }
  0x31   : > { %p618_p9 = pnand %p617_p5, %p611_p0 }
  0x33   : > { %621 = shalt.err (!%p618_p9)
}
  0x34   : > { %s622_s23 = scalar_lea.vmem %s872_s3, 32  ;;  %s726_s27 = smov [#allocation6]  }
  0x35   : > { %p623_p11 = scmp.ne.s32.totalorder %s872_s3, %s622_s23  ;;  %s627_s28 = sshll.u32 %s726_s27, 4  ;;  %s628_s28 = int_to_ptr.vmem [resolvable:$false] %s627_s28 }
  0x36   : > { %s629_s29 = scalar_lea.vmem %s628_s28, 64  ;;  %p630_p1 = scmp.lt.s32.totalorder %s872_s3, %s628_s28 }
  0x37   : > { %p625_p13 = pnand %p623_p11, %p609_p12  ;;  %p631_p7 = scmp.lt.s32.totalorder %s629_s29, %s622_s23 }
  0x39   : > { %p626_p4 = pneg %p625_p13  ;;  %p632_p10 = por %p631_p7, %p630_p1 }
  0x3b   : > { %p633_p6 = pnand %p632_p10, %p626_p4 }
  0x3d   : > { %636 = shalt.err (!%p633_p6)
}
  0x3e   : > { %532 = dma.hbm_to_vmem [thread:$0]  (!%p876_p2), %s870_s30, 32, %s872_s3, %s136_s25  }
  0x3f   : > { %158 = sbr.rel (%p801_p8) target bundleno = 132 (0x84), region = 28  ;;  %p1066_p9 = scmp.ne.s32.totalorder (!%p801_p8), %s1056_s17, 0 }
  0x46   : > { %690 = dma.done.wait (%p1066_p9), [#allocation5], 32  }
  0x47   : > { %692 = vsyncadd (%p1066_p9), [#allocation5], 4294967264  ;;  %s912_s18 = sand.u32 1, %s707_s10   ;;  %p1067_p1 = scmp.ne.s32.totalorder %s1058_s19, 0 }
  0x48   : > { %s503_s5 = sshll.u32 %s912_s18, 1  ;;  %s165_s4 = scalar_lea.sflag [#allocation3], %s912_s18 }
  0x49   : > { %s916_s6 = scalar_lea.vmem [#allocation6], %s503_s5 }
  0x4a   : > { %694 = dma.done.wait (%p1067_p1), %s165_s4, 32  }
  0x4b   : > { %696 = vsyncadd (%p1067_p1), %s165_s4, 4294967264 }
  0x4c   : > { %173 = sfence }
  0x4d   : > { %v191_v0 = vlaneseq  ;;  %v727_v1 = vmov 1966171168   ;;  %s504_s17 = sshll.u32 %s912_s18, 3  ;;  %s924_s21 = sshll.u32 %s715_s12, 7  ;;  %v728_v6 = vmov 1.0  }
  0x4e   : > { %v308_v2 = vunpack.c.l.s4 %v727_v1  ;;  %v351_v7 = vcombine.low %v728_v6, %v728_v6  ;;  %s233_s19 = sadd.s32 1, %s924_s21  ;;  %s235_s30 = sadd.s32 2, %s924_s21  ;;  %v190_v24 = vld [vmem:[%s916_s6] sm:$0x3] }
  0x4f   : > { %v192_v3 = vshrl.u32 %v191_v0, 7  ;;  %v196_v4 = vand.u32 127, %v191_v0  ;;  %s237_s3 = sadd.s32 3, %s924_s21  ;;  %s239_s12 = sadd.s32 4, %s924_s21  ;;  %vm939_vm0 = vcmp.lt.s32.totalorder %v191_v0, 256 }
  0x50   : > { %v309_v5 = vunpack.c.0.s8 %v308_v2  ;;  %s241_s25 = sadd.s32 5, %s924_s21  ;;  %s935_s7 = sld [smem:[#allocation2 + %s924_s21]] }
  0x51   : > { %v197_v8 = vadd.s32 128, %v196_v4  ;;  %v198_v9 = vmul.u32 256, %v192_v3  ;;  %s937_s16 = sld [smem:[#allocation2 + %s233_s19]]  ;;  %s243_s28 = sadd.s32 6, %s924_s21  ;;  %v263_v22 = vsub.s32 0, %v192_v3  ;;  %v267_v23 = vsub.s32 1, %v192_v3 }
  0x52   : > { %v927_v10 = vsub.s32 %v309_v5, %v192_v3  ;;  %s943_s8 = sld [smem:[#allocation2 + %s235_s30]]  ;;  %s245_s29 = sadd.s32 7, %s924_s21 }
  0x53   : > { %v199_v11 = vadd.s32 %v198_v9, %v196_v4  ;;  %v200_v12 = vadd.s32 %v198_v9, %v197_v8  ;;  %s945_s24 = sld [smem:[#allocation2 + %s237_s3]]  ;;  %s956_s5 = scalar_lea.vmem [#allocation7], %s504_s17  ;;  %v264_v31 = vrot.slane %v190_v24, %v263_v22  ;;  %v268_v32 = vrot.slane %v190_v24, %v267_v23 }
  0x54   : > { %v358_v13 = vrot.slane %v351_v7, %v927_v10  ;;  %s948_s23 = sld [smem:[#allocation2 + %s239_s12]]  ;;  %s247_s19 = sadd.s32 8, %s924_s21 }
  0x55   : > { %v201_v14 = vcvt.s32.f32 %v199_v11  ;;  %v202_v15 = vcvt.s32.f32 %v200_v12  ;;  %s950_s27 = sld [smem:[#allocation2 + %s241_s25]]  ;;  %s394_s30 = sshll.u32 %s956_s5, 4  ;;  %s982_s30 = int_to_ptr.vmem [resolvable:$true] %s394_s30 }
  0x56   : > { %v365_v17 = vrot.slane %v358_v13, %v927_v10  ;;  %s962_s4 = sld [smem:[#allocation2 + %s243_s28]]  ;;  %v249_v33 = vstv %s935_s7  ;;  %s990_s25 = scalar_lea.hbm %s1051_s2, %s924_s21 }
  0x57   : > { %v203_v18 = vmul.f32 0.0625, %v201_v14  ;;  %v204_v19 = vmul.f32 0.0625, %v202_v15  ;;  %s964_s17 = sld [smem:[#allocation2 + %s245_s29]]  ;;  %v252_v34 = vstv %s937_s16  ;;  %s379_s7 = scalar_lea.sflag [#allocation4], %s912_s18 }
  0x58   : > { %377 = vst.msk [vmem:[%s956_s5 + $0x6] sm:$0x3] %vm939_vm0, %v365_v17  ;;  %v257_v35 = vstv %s943_s8  ;;  %s973_s6 = sld [smem:[#allocation2 + %s247_s19]]  ;;  %s637_s16 = scalar_lea.vmem %s982_s30, 128 }
  0x59   : > { %v205_v20 = vfloor.f32 %v203_v18  ;;  %v206_v21 = vfloor.f32 %v204_v19  ;;  %v273_v36 = vstv %s945_s24  ;;  %p638_p4 = scmp.ne.s32.totalorder %s982_s30, %s637_s16  ;;  %p1070_p8 = scmp.ne.s32.totalorder %s1064_s15, 0 }
  0x5a   : > { %v276_v41 = vstv %s948_s23  ;;  %s729_s8 = smov [#allocation7]  }
  0x5b   : > { %v207_v25 = vmul.f32 16.0, %v205_v20  ;;  %v208_v26 = vmul.f32 16.0, %v206_v21  ;;  %v505_v27 = vadd.f32 -1.0, %v205_v20  ;;  %v506_v28 = vadd.f32 -1.0, %v206_v21  ;;  %p639_p2 = pnand %p638_p4, %p1070_p8  ;;  %s641_s21 = sshll.u32 %s729_s8, 4  ;;  %s642_s21 = int_to_ptr.vmem [resolvable:$false] %s641_s21 }
  0x5c   : > { %v281_v42 = vstv %s950_s27  ;;  %v286_v51 = vstv %s962_s4  ;;  %s643_s24 = scalar_lea.vmem %s642_s21, 256  ;;  %p644_p0 = scmp.lt.s32.totalorder %s982_s30, %s642_s21 }
  0x5d   : > { %v209_v29 = vsub.f32 %v201_v14, %v207_v25  ;;  %v210_v30 = vsub.f32 %v202_v15, %v208_v26  ;;  %v289_v52 = vstv %s964_s17  ;;  %p640_p12 = pneg %p639_p2  ;;  %p645_p3 = scmp.lt.s32.totalorder %s643_s24, %s637_s16 }
  0x5e   : > { %v294_v7 = vstv %s973_s6 }
  0x5f   : > { %vm211_vm1 = vcmp.lt.f32.partialorder %v209_v29, 0.0  ;;  %vm212_vm2 = vcmp.lt.f32.partialorder %v210_v30, 0.0  ;;  %v217_v37 = vadd.f32 16.0, %v209_v29  ;;  %v218_v38 = vadd.f32 16.0, %v210_v30  ;;  %p646_p5 = por %p645_p3, %p644_p0 }
  0x60   : > { %v215_v39 = vsel %vm211_vm1, %v505_v27, %v205_v20  ;;  %v216_v40 = vsel %vm212_vm2, %v506_v28, %v206_v21 }
  0x61   : > { %v219_v43 = vsel %vm211_vm1, %v217_v37, %v209_v29  ;;  %v220_v44 = vsel %vm212_vm2, %v218_v38, %v210_v30  ;;  %v223_v45 = vadd.f32 1.0, %v215_v39  ;;  %v224_v46 = vadd.f32 1.0, %v216_v40  ;;  %p647_p11 = pnand %p646_p5, %p640_p12 }
  0x62   : > { %vm221_vm3 = vcmp.ge.f32.partialorder %v219_v43, 16.0  ;;  %vm222_vm4 = vcmp.ge.f32.partialorder %v220_v44, 16.0  ;;  %v507_v47 = vadd.f32 -16.0, %v219_v43  ;;  %v508_v48 = vadd.f32 -16.0, %v220_v44 }
  0x63   : > { %v225_v49 = vsel %vm221_vm3, %v223_v45, %v215_v39  ;;  %v226_v50 = vsel %vm222_vm4, %v224_v46, %v216_v40 }
  0x64   : > { %v229_v53 = vsel %vm221_vm3, %v507_v47, %v219_v43  ;;  %v230_v54 = vsel %vm222_vm4, %v508_v48, %v220_v44  ;;  %v253_v55 = vmul.f32 %v252_v34, %v225_v49  ;;  %v254_v56 = vmul.f32 %v252_v34, %v226_v50 }
  0x65   : > { %v250_v57 = vmul.f32 %v249_v33, %v229_v53  ;;  %v251_v58 = vmul.f32 %v249_v33, %v230_v54  ;;  %v274_v59 = vmul.f32 %v273_v36, %v229_v53  ;;  %v275_v60 = vmul.f32 %v273_v36, %v230_v54 }
  0x66   : > { %v277_v61 = vmul.f32 %v276_v41, %v225_v49  ;;  %v278_v62 = vmul.f32 %v276_v41, %v226_v50  ;;  %v287_v63 = vmul.f32 %v286_v51, %v229_v53  ;;  %v288_v0 = vmul.f32 %v286_v51, %v230_v54 }
  0x67   : > { %v255_v1 = vadd.f32 %v253_v55, %v250_v57  ;;  %v256_v2 = vadd.f32 %v254_v56, %v251_v58  ;;  %v290_v3 = vmul.f32 %v289_v52, %v225_v49  ;;  %v291_v4 = vmul.f32 %v289_v52, %v226_v50 }
  0x68   : > { %v279_v5 = vadd.f32 %v277_v61, %v274_v59  ;;  %v280_v6 = vadd.f32 %v278_v62, %v275_v60 }
  0x69   : > { %v258_v8 = vadd.f32 %v257_v35, %v255_v1  ;;  %v259_v9 = vadd.f32 %v257_v35, %v256_v2  ;;  %v292_v11 = vadd.f32 %v290_v3, %v287_v63  ;;  %v293_v12 = vadd.f32 %v291_v4, %v288_v0 }
  0x6a   : > { %v282_v13 = vadd.f32 %v281_v42, %v279_v5  ;;  %v283_v14 = vadd.f32 %v281_v42, %v280_v6 }
  0x6b   : > { %v271_v15 = vmul.f32 %v264_v31, %v258_v8  ;;  %v272_v17 = vmul.f32 %v268_v32, %v259_v9  ;;  %v295_v18 = vadd.f32 %v294_v7, %v292_v11  ;;  %v296_v19 = vadd.f32 %v294_v7, %v293_v12 }
  0x6c   : > { %v284_v20 = vmul.f32 %v282_v13, %v264_v31  ;;  %v285_v21 = vmul.f32 %v283_v14, %v268_v32 }
  0x6d   : > { %v306_v22 = vcombine.low %v271_v15, %v272_v17  ;;  %v297_v23 = vmul.f32 %v295_v18, %v264_v31  ;;  %v298_v24 = vmul.f32 %v296_v19, %v268_v32 }
  0x6e   : > { %v321_v25 = vcombine.low %v284_v20, %v285_v21 }
  0x6f   : > { %v313_v26 = vrot.slane %v306_v22, %v927_v10  ;;  %v336_v27 = vcombine.low %v297_v23, %v298_v24 }
  0x70   : > { %v328_v28 = vrot.slane %v321_v25, %v927_v10 }
  0x71   : > { %v320_v29 = vrot.slane %v313_v26, %v927_v10  ;;  %v343_v30 = vrot.slane %v336_v27, %v927_v10 }
  0x72   : > { %v335_v31 = vrot.slane %v328_v28, %v927_v10 }
  0x73   : > { %374 = vst.msk [vmem:[%s956_s5] sm:$0x3] %vm939_vm0, %v320_v29  ;;  %v350_v32 = vrot.slane %v343_v30, %v927_v10 }
  0x74   : > { %375 = vst.msk [vmem:[%s956_s5 + $0x2] sm:$0x3] %vm939_vm0, %v335_v31 }
  0x75   : > { %376 = vst.msk [vmem:[%s956_s5 + $0x4] sm:$0x3] %vm939_vm0, %v350_v32 }
  0x76   : > { %650 = shalt.err (!%p647_p11)
}
  0x77   : > { %s651_s23 = scalar_lea.hbm %s990_s25, 128  ;;  %s655_s29 = scalar_lea.hbm %s1051_s2, 256 }
  0x78   : > { %p652_p13 = scmp.ne.s32.totalorder %s990_s25, %s651_s23  ;;  %p656_p6 = scmp.lt.u32.totalorder %s990_s25, %s1051_s2 }
  0x79   : > { %p657_p9 = scmp.lt.u32.totalorder %s655_s29, %s651_s23  ;;  %p659_p4 = scmp.lt.u32.totalorder %s651_s23, %s990_s25 }
  0x7a   : > { %p653_p7 = pnand %p652_p13, %p1070_p8 }
  0x7b   : > { %p658_p1 = por %p657_p9, %p656_p6 }
  0x7c   : > { %p654_p10 = pneg %p653_p7 }
  0x7d   : > { %p660_p2 = por %p659_p4, %p658_p1 }
  0x7f   : > { %p661_p12 = pnand %p660_p2, %p654_p10 }
  0x81   : > { %664 = shalt.err (!%p661_p12)
}
  0x82   : > { %s730_s17 = smov 32   ;;  %s731_s19 = smov 2  }
  0x83   : > { %523 = dma.vmem_to_hbm [thread:$0]  (%p1070_p8), %s982_s30, 128, %s990_s25, %s379_s7, %s730_s17, %s730_s17, %s731_s19  }
  0x84 PF: > { %s409_s6 = sand.u32 1, %s703_s9   ;;  %p1071_p0 = scmp.ne.s32.totalorder %s1059_s20, 0 }
  0x85   : > { %p1072_p3 = scmp.ge.s32.totalorder %s723_s14, 2  ;;  %s410_s3 = scalar_lea.sflag [#allocation4], %s409_s6 }
  0x87   : > { %p534_p5 = pnand %p1072_p3, %p1071_p0 }
  0x89   : > { %698 = dma.done.wait (!%p534_p5), %s410_s3, 128  }
  0x8a   : > { %700 = vsyncadd (!%p534_p5), %s410_s3, 4294967168  ;;  %s19_s14 = sadd.s32 1, %s723_s14   ;;  %s1073_s9 = smov %s707_s10 }
  0x8b   : > { %p16_p11 = scmp.ge.s32.totalorder %s19_s14, 4   ;;  %s1074_s10 = smov %s711_s11 }
  0x8c   : > { %s1075_s11 = smov %s864_s26  ;;  %s1076_s12 = smov %s719_s13 }
  0x8d   : > { %s1077_s13 = smov %s1079_s22  ;;  %18 = sbr.rel (!%p16_p11) target bundleno = 7 (0x7), region = 78 }
  0x94   :  { %415 = vsyncpa [#allocation3], 1 }
  0x95   :  { %417 = vsyncpa [#allocation3 + $0x1], 1 }
  0x96   :  { %418 = vsyncpa [#allocation4], 1 }
  0x97   :  { %420 = vsyncpa [#allocation4 + $0x1], 1 }
  0x98   :  { %421 = vsyncpa [#allocation5], 1 }
  0x99   :  { %423 = vsyncpa [#allocation5 + $0x1], 1 }

</bundles_post_ra>
